<compile_context>
chip_gen: v6e
topology: v6e:2x2x1
jax: 0.10.0
libtpu: 0.0.40
codegen_flags: <defaults>
</compile_context>

<pallas_src>
import jax
import jax.numpy as jnp
from jax.experimental import pallas as pl
from jax.experimental.pallas import tpu as pltpu


def _gather_kernel(t_ref, beta_ref, alpha_ref, beta_out_ref, alpha_out_ref):
    # All refs are in SMEM: this is pure scalar load/store work.
    #   t_ref:         (N,) int32   -- clamped timestep indices
    #   beta_ref:      (T,) float32
    #   alpha_ref:     (T,) float32 -- alpha_cumprod
    #   beta_out_ref:  (N,) float32
    #   alpha_out_ref: (N,) float32
    n = t_ref.shape[0]
    for i in range(n):           # static unroll; N is small (scheduler queries)
        ti = t_ref[i]            # scalar int32 from SMEM
        beta_out_ref[i] = beta_ref[ti]     # dynamic scalar SMEM gather
        alpha_out_ref[i] = alpha_ref[ti]


class DDPMSchedulerPallas:
    """JAX/Pallas port of DDPM_Scheduler."""

    def __init__(self, num_time_steps: int = 1000):
        self.num_time_steps = num_time_steps

        # Deterministic buffer construction (matches torch.linspace / cumprod).
        beta = jnp.linspace(0.0001, 0.02, num_time_steps, dtype=jnp.float32)
        alpha = 1.0 - beta
        alpha_cumprod = jnp.cumprod(alpha, axis=0)

        # Buffers kept 1-D, exactly like the PyTorch module's registered buffers.
        self.beta = beta                  # (T,)
        self.alpha = alpha_cumprod        # (T,)  (alpha_cumprod, as in the spec)

    def __call__(self, t):
        t = jnp.asarray(t, dtype=jnp.int32)
        orig_shape = t.shape
        t_flat = t.reshape(-1)
        # PyTorch indexing would raise IndexError on out-of-range t; we clamp
        # instead (the SMEM scalar gather is unchecked).  Intentional divergence.
        t_flat = jnp.clip(t_flat, 0, self.num_time_steps - 1)
        n = t_flat.shape[0]

        smem = pl.BlockSpec(memory_space=pltpu.MemorySpace.SMEM)
        beta_t, alpha_t = pl.pallas_call(
            _gather_kernel,
            out_shape=(
                jax.ShapeDtypeStruct((n,), jnp.float32),
                jax.ShapeDtypeStruct((n,), jnp.float32),
            ),
            in_specs=[smem, smem, smem],
            out_specs=(smem, smem),
        )(t_flat, self.beta, self.alpha)

        # Match PyTorch output shapes: beta[t] / alpha[t] preserve t's shape.
        return beta_t.reshape(orig_shape), alpha_t.reshape(orig_shape)


if __name__ == "__main__":
    key = jax.random.PRNGKey(0)
    num_time_steps = 1000
    batch = 8  # number of timesteps queried per forward call

    sched = DDPMSchedulerPallas(num_time_steps=num_time_steps)

    t = jax.random.randint(key, (batch,), 0, num_time_steps, dtype=jnp.int32)

    beta_t, alpha_t = sched(t)
    jax.block_until_ready((beta_t, alpha_t))

    # Reference check against plain-JAX gather on the buffers.
    beta_ref = sched.beta[t]
    alpha_ref = sched.alpha[t]
    assert beta_t.shape == (batch,) and alpha_t.shape == (batch,)
    assert jnp.allclose(beta_t, beta_ref, atol=0.0, rtol=0.0), "beta mismatch"
    assert jnp.allclose(alpha_t, alpha_ref, atol=0.0, rtol=0.0), "alpha mismatch"

    print("KERNEL_OK")
</pallas_src>

<mosaic_0001>
module attributes {stable_mosaic.version = 11 : i64} {
  func.func @_gather_kernel(%arg0: memref<8xi32, #tpu.memory_space<smem>>, %arg1: memref<1000xf32, #tpu.memory_space<smem>>, %arg2: memref<1000xf32, #tpu.memory_space<smem>>, %arg3: memref<8xf32, #tpu.memory_space<smem>>, %arg4: memref<8xf32, #tpu.memory_space<smem>>) attributes {dimension_semantics = [], scalar_prefetch = 0 : i64, scratch_operands = 0 : i64, tpu.core_type = #tpu.core_type<tc>} {
    %c0 = arith.constant 0 : index
    %0 = memref.load %arg0[%c0] : memref<8xi32, #tpu.memory_space<smem>>
    %1 = arith.index_cast %0 : i32 to index
    %2 = memref.load %arg1[%1] : memref<1000xf32, #tpu.memory_space<smem>>
    %c0_0 = arith.constant 0 : index
    %3 = memref.load %arg3[%c0_0] : memref<8xf32, #tpu.memory_space<smem>>
    memref.store %2, %arg3[%c0_0] : memref<8xf32, #tpu.memory_space<smem>>
    %4 = arith.index_cast %0 : i32 to index
    %5 = memref.load %arg2[%4] : memref<1000xf32, #tpu.memory_space<smem>>
    %c0_1 = arith.constant 0 : index
    %6 = memref.load %arg4[%c0_1] : memref<8xf32, #tpu.memory_space<smem>>
    memref.store %5, %arg4[%c0_1] : memref<8xf32, #tpu.memory_space<smem>>
    %c1 = arith.constant 1 : index
    %7 = memref.load %arg0[%c1] : memref<8xi32, #tpu.memory_space<smem>>
    %8 = arith.index_cast %7 : i32 to index
    %9 = memref.load %arg1[%8] : memref<1000xf32, #tpu.memory_space<smem>>
    %c1_2 = arith.constant 1 : index
    %10 = memref.load %arg3[%c1_2] : memref<8xf32, #tpu.memory_space<smem>>
    memref.store %9, %arg3[%c1_2] : memref<8xf32, #tpu.memory_space<smem>>
    %11 = arith.index_cast %7 : i32 to index
    %12 = memref.load %arg2[%11] : memref<1000xf32, #tpu.memory_space<smem>>
    %c1_3 = arith.constant 1 : index
    %13 = memref.load %arg4[%c1_3] : memref<8xf32, #tpu.memory_space<smem>>
    memref.store %12, %arg4[%c1_3] : memref<8xf32, #tpu.memory_space<smem>>
    %c2 = arith.constant 2 : index
    %14 = memref.load %arg0[%c2] : memref<8xi32, #tpu.memory_space<smem>>
    %15 = arith.index_cast %14 : i32 to index
    %16 = memref.load %arg1[%15] : memref<1000xf32, #tpu.memory_space<smem>>
    %c2_4 = arith.constant 2 : index
    %17 = memref.load %arg3[%c2_4] : memref<8xf32, #tpu.memory_space<smem>>
    memref.store %16, %arg3[%c2_4] : memref<8xf32, #tpu.memory_space<smem>>
    %18 = arith.index_cast %14 : i32 to index
    %19 = memref.load %arg2[%18] : memref<1000xf32, #tpu.memory_space<smem>>
    %c2_5 = arith.constant 2 : index
    %20 = memref.load %arg4[%c2_5] : memref<8xf32, #tpu.memory_space<smem>>
    memref.store %19, %arg4[%c2_5] : memref<8xf32, #tpu.memory_space<smem>>
    %c3 = arith.constant 3 : index
    %21 = memref.load %arg0[%c3] : memref<8xi32, #tpu.memory_space<smem>>
    %22 = arith.index_cast %21 : i32 to index
    %23 = memref.load %arg1[%22] : memref<1000xf32, #tpu.memory_space<smem>>
    %c3_6 = arith.constant 3 : index
    %24 = memref.load %arg3[%c3_6] : memref<8xf32, #tpu.memory_space<smem>>
    memref.store %23, %arg3[%c3_6] : memref<8xf32, #tpu.memory_space<smem>>
    %25 = arith.index_cast %21 : i32 to index
    %26 = memref.load %arg2[%25] : memref<1000xf32, #tpu.memory_space<smem>>
    %c3_7 = arith.constant 3 : index
    %27 = memref.load %arg4[%c3_7] : memref<8xf32, #tpu.memory_space<smem>>
    memref.store %26, %arg4[%c3_7] : memref<8xf32, #tpu.memory_space<smem>>
    %c4 = arith.constant 4 : index
    %28 = memref.load %arg0[%c4] : memref<8xi32, #tpu.memory_space<smem>>
    %29 = arith.index_cast %28 : i32 to index
    %30 = memref.load %arg1[%29] : memref<1000xf32, #tpu.memory_space<smem>>
    %c4_8 = arith.constant 4 : index
    %31 = memref.load %arg3[%c4_8] : memref<8xf32, #tpu.memory_space<smem>>
    memref.store %30, %arg3[%c4_8] : memref<8xf32, #tpu.memory_space<smem>>
    %32 = arith.index_cast %28 : i32 to index
    %33 = memref.load %arg2[%32] : memref<1000xf32, #tpu.memory_space<smem>>
    %c4_9 = arith.constant 4 : index
    %34 = memref.load %arg4[%c4_9] : memref<8xf32, #tpu.memory_space<smem>>
    memref.store %33, %arg4[%c4_9] : memref<8xf32, #tpu.memory_space<smem>>
    %c5 = arith.constant 5 : index
    %35 = memref.load %arg0[%c5] : memref<8xi32, #tpu.memory_space<smem>>
    %36 = arith.index_cast %35 : i32 to index
    %37 = memref.load %arg1[%36] : memref<1000xf32, #tpu.memory_space<smem>>
    %c5_10 = arith.constant 5 : index
    %38 = memref.load %arg3[%c5_10] : memref<8xf32, #tpu.memory_space<smem>>
    memref.store %37, %arg3[%c5_10] : memref<8xf32, #tpu.memory_space<smem>>
    %39 = arith.index_cast %35 : i32 to index
    %40 = memref.load %arg2[%39] : memref<1000xf32, #tpu.memory_space<smem>>
    %c5_11 = arith.constant 5 : index
    %41 = memref.load %arg4[%c5_11] : memref<8xf32, #tpu.memory_space<smem>>
    memref.store %40, %arg4[%c5_11] : memref<8xf32, #tpu.memory_space<smem>>
    %c6 = arith.constant 6 : index
    %42 = memref.load %arg0[%c6] : memref<8xi32, #tpu.memory_space<smem>>
    %43 = arith.index_cast %42 : i32 to index
    %44 = memref.load %arg1[%43] : memref<1000xf32, #tpu.memory_space<smem>>
    %c6_12 = arith.constant 6 : index
    %45 = memref.load %arg3[%c6_12] : memref<8xf32, #tpu.memory_space<smem>>
    memref.store %44, %arg3[%c6_12] : memref<8xf32, #tpu.memory_space<smem>>
    %46 = arith.index_cast %42 : i32 to index
    %47 = memref.load %arg2[%46] : memref<1000xf32, #tpu.memory_space<smem>>
    %c6_13 = arith.constant 6 : index
    %48 = memref.load %arg4[%c6_13] : memref<8xf32, #tpu.memory_space<smem>>
    memref.store %47, %arg4[%c6_13] : memref<8xf32, #tpu.memory_space<smem>>
    %c7 = arith.constant 7 : index
    %49 = memref.load %arg0[%c7] : memref<8xi32, #tpu.memory_space<smem>>
    %50 = arith.index_cast %49 : i32 to index
    %51 = memref.load %arg1[%50] : memref<1000xf32, #tpu.memory_space<smem>>
    %c7_14 = arith.constant 7 : index
    %52 = memref.load %arg3[%c7_14] : memref<8xf32, #tpu.memory_space<smem>>
    memref.store %51, %arg3[%c7_14] : memref<8xf32, #tpu.memory_space<smem>>
    %53 = arith.index_cast %49 : i32 to index
    %54 = memref.load %arg2[%53] : memref<1000xf32, #tpu.memory_space<smem>>
    %c7_15 = arith.constant 7 : index
    %55 = memref.load %arg4[%c7_15] : memref<8xf32, #tpu.memory_space<smem>>
    memref.store %54, %arg4[%c7_15] : memref<8xf32, #tpu.memory_space<smem>>
    return
  }
}

</mosaic_0001>

<bundles_post_ra>
// kernel: tpu_custom_call.1
= control target key start
LH: loop header
LB: loop body
LE: loop exit
PB: predicated region body
PF: predicated region fallthrough
CT: control target
= control target key end

     0   :  { %10 = vsyncpa [#allocation3], 0  ;;  %s244_s0 = inlined_call_operand.hbm [shape: s32[8], index: 0, kind: input, shape index: {}]   ;;  %s245_s1 = inlined_call_operand.hbm [shape: f32[1000], index: 1, kind: input, shape index: {}]   ;;  %s246_s2 = inlined_call_operand.hbm [shape: f32[1000], index: 2, kind: input, shape index: {}]   ;;  %s247_s3 = inlined_call_operand.hbm [shape: f32[8], index: 3, kind: output, shape index: {0}]   ;;  %s248_s4 = inlined_call_operand.hbm [shape: f32[8], index: 4, kind: output, shape index: {1}]  }
   0x1   :  { %11 = vsyncpa [#allocation6], 0 }
   0x2   :  { %12 = vsyncpa [#allocation4], 0 }
   0x3   :  { %13 = vsyncpa [#allocation10], 0  ;;  %s191_s15 = smov [#allocation5]   ;;  %s192_s18 = smov [#allocation2]  }
   0x4   :  { %29 = dma.hbm_to_smem %s245_s1, 128, %s191_s15, [#allocation6]  }
   0x5   :  { %21 = dma.hbm_to_smem %s244_s0, 16, %s192_s18, [#allocation3]  }
   0x6   :  { %s193_s21 = smov [#allocation7]  }
   0x7   :  { %37 = dma.hbm_to_smem %s246_s2, 128, %s193_s21, [#allocation6]  }
   0x8   :  { %183 = dma.done.wait [#allocation3], 16  }
   0x9   :  { %184 = vsyncadd [#allocation3], 4294967280 }
   0xa   :  { %185 = dma.done.wait [#allocation6], 256  }
   0xb   :  { %186 = vsyncadd [#allocation6], 4294967040 }
   0xc   :  { %47 = sfence }
   0xd   :  { %s48_s24 = sld [smem:[#allocation2]]  ;;  %s194_s15 = smov [#allocation8]  }
   0xe   :  { %s131_s25 = sld [smem:[#allocation2 + $0x1]]  ;;  %s195_s22 = smov [#allocation9]  }
   0xf   :  { %s132_s26 = sld [smem:[#allocation2 + $0x2]] }
  0x10   :  { %s133_s27 = sld [smem:[#allocation2 + $0x3]] }
  0x11   :  { %s230_s1 = sld [smem:[#allocation2 + $0x4]] }
  0x12   :  { %s232_s28 = sld [smem:[#allocation2 + $0x5]] }
  0x13   :  { %s49_s0 = sld [smem:[#allocation5 + %s48_s24]] }
  0x14   :  { %s56_s29 = sld [smem:[#allocation5 + %s131_s25]] }
  0x15   :  { %s63_s30 = sld [smem:[#allocation5 + %s132_s26]] }
  0x16   :  { %s70_s5 = sld [smem:[#allocation5 + %s133_s27]] }
  0x17   :  { %s77_s2 = sld [smem:[#allocation5 + %s230_s1]] }
  0x18   :  { %s84_s6 = sld [smem:[#allocation5 + %s232_s28]] }
  0x19   :  { %51 = sst [smem:[#allocation8]] %s49_s0 }
  0x1a   :  { %58 = sst [smem:[#allocation8 + $0x1]] %s56_s29 }
  0x1b   :  { %65 = sst [smem:[#allocation8 + $0x2]] %s63_s30 }
  0x1c   :  { %72 = sst [smem:[#allocation8 + $0x3]] %s70_s5 }
  0x1d   :  { %79 = sst [smem:[#allocation8 + $0x4]] %s77_s2 }
  0x1e   :  { %86 = sst [smem:[#allocation8 + $0x5]] %s84_s6 }
  0x1f   :  { %s136_s7 = sld [smem:[#allocation2 + $0x6]] }
  0x20   :  { %s137_s8 = sld [smem:[#allocation2 + $0x7]] }
  0x21   :  { %s52_s9 = sld [smem:[#allocation7 + %s48_s24]] }
  0x22   :  { %s59_s10 = sld [smem:[#allocation7 + %s131_s25]] }
  0x23   :  { %s66_s11 = sld [smem:[#allocation7 + %s132_s26]] }
  0x24   :  { %s73_s12 = sld [smem:[#allocation7 + %s133_s27]] }
  0x25   :  { %s91_s13 = sld [smem:[#allocation5 + %s136_s7]] }
  0x26   :  { %s98_s14 = sld [smem:[#allocation5 + %s137_s8]] }
  0x27   :  { %54 = sst [smem:[#allocation9]] %s52_s9 }
  0x28   :  { %61 = sst [smem:[#allocation9 + $0x1]] %s59_s10 }
  0x29   :  { %68 = sst [smem:[#allocation9 + $0x2]] %s66_s11 }
  0x2a   :  { %75 = sst [smem:[#allocation9 + $0x3]] %s73_s12 }
  0x2b   :  { %93 = sst [smem:[#allocation8 + $0x6]] %s91_s13 }
  0x2c   :  { %100 = sst [smem:[#allocation8 + $0x7]] %s98_s14 }
  0x2d   :  { %111 = dma.smem_to_hbm %s194_s15, 16, %s247_s3, [#allocation4]  }
  0x2e   :  { %s80_s18 = sld [smem:[#allocation7 + %s230_s1]] }
  0x2f   :  { %s87_s19 = sld [smem:[#allocation7 + %s232_s28]] }
  0x30   :  { %s94_s20 = sld [smem:[#allocation7 + %s136_s7]] }
  0x31   :  { %s101_s21 = sld [smem:[#allocation7 + %s137_s8]] }
  0x34   :  { %82 = sst [smem:[#allocation9 + $0x4]] %s80_s18 }
  0x35   :  { %89 = sst [smem:[#allocation9 + $0x5]] %s87_s19 }
  0x36   :  { %96 = sst [smem:[#allocation9 + $0x6]] %s94_s20 }
  0x37   :  { %103 = sst [smem:[#allocation9 + $0x7]] %s101_s21 }
  0x38   :  { %119 = dma.smem_to_hbm %s195_s22, 16, %s248_s4, [#allocation10]  }
  0x39   :  { %187 = dma.done.wait [#allocation4], 16  }
  0x3a   :  { %188 = vsyncadd [#allocation4], 4294967280 }
  0x3b   :  { %189 = dma.done.wait [#allocation10], 16  }
  0x3c   :  { %190 = vsyncadd [#allocation10], 4294967280 }
  0x3d   :  { %126 = sfence }
  0x3e   :  { %127 = vsyncpa [#allocation3], 1 }
  0x3f   :  { %128 = vsyncpa [#allocation6], 1 }
  0x40   :  { %129 = vsyncpa [#allocation4], 1 }
  0x41   :  { %130 = vsyncpa [#allocation10], 1 }

</bundles_post_ra>
